<compile_context>
chip_gen: v7x
topology: tpu7x:2x2x1
jax: 0.10.0
libtpu: 0.0.40
codegen_flags: <defaults>
</compile_context>

<pallas_src>
import numpy as np
import jax
import jax.numpy as jnp
from jax.experimental import pallas as pl
from jax.experimental.pallas import tpu as pltpu

_SQRT2 = np.float32(np.sqrt(2.0))
_MAX_TILE_N = 2048     # rows per grid step (multiple of 8); 2048 x 32 f32 = 256 KiB/block
_EXACT_PARITY = True   # keep PyTorch's exact cast/multiply ordering


def _mpfourier_kernel(x_ref, fp_ref, out_ref):
    # x_ref:   (tile_n, 1) in x.dtype
    # fp_ref:  (2, C) float32 -- row 0 = freqs, row 1 = phases
    # out_ref: (tile_n, C) in x.dtype
    fp = fp_ref[...]                           # (2, C) f32
    freqs = fp[0:1, :]                         # (1, C)
    phases = fp[1:2, :]                        # (1, C)
    x_f32 = x_ref[...].astype(jnp.float32)     # (tile_n, 1)

    if _EXACT_PARITY:
        # Matches PyTorch: cos(outer(x, f) + p) * sqrt(2), cast to x.dtype, then * x.
        y = jnp.cos(x_f32 * freqs + phases) * _SQRT2        # (tile_n, C) f32
        out_ref[...] = x_ref[...] * y.astype(out_ref.dtype)
    else:
        # sqrt(2) folded into the per-row x column; final multiply in f32 with a
        # single downcast (cheaper on v5e for bf16 x; only last-ulp differences).
        xs = x_f32 * _SQRT2                                  # (tile_n, 1)
        out_ref[...] = (xs * jnp.cos(x_f32 * freqs + phases)).astype(out_ref.dtype)


def prepare_mp_fourier_table(freqs, phases):
    """One-time prep (module-init analogue of the PyTorch buffers):
    pack freqs/phases into a (2, C) float32 table."""
    return jnp.stack(
        [jnp.asarray(freqs, jnp.float32), jnp.asarray(phases, jnp.float32)], axis=0
    )


def mp_fourier(x, fp_table):
    """x: (N,) array; fp_table: (2, C) float32 from prepare_mp_fourier_table.
    Returns (N, C) in x.dtype."""
    N = x.shape[0]
    C = fp_table.shape[1]

    # Single full-extent block for small/medium N (full-dim exemption from the
    # (8,128) rule on both axes); otherwise fixed 2048-row tiles (multiple of 8)
    # so large N gets grid >= 2 and row tiles shard across TCs on v7x.
    tile_n = N if N <= _MAX_TILE_N else _MAX_TILE_N
    grid_n = pl.cdiv(N, tile_n)

    x2 = x.reshape(N, 1)  # metadata-only reshape; puts x on the sublane axis

    itemsize = jnp.dtype(x.dtype).itemsize
    cost = pl.CostEstimate(
        flops=4 * N * C,                       # outer product, +phase, *sqrt2, *x
        transcendentals=N * C,                 # the cosines (the real cost)
        bytes_accessed=N * itemsize + 2 * C * 4 + N * C * itemsize,
    )

    return pl.pallas_call(
        _mpfourier_kernel,
        out_shape=jax.ShapeDtypeStruct((N, C), x.dtype),
        grid_spec=pltpu.PrefetchScalarGridSpec(
            num_scalar_prefetch=0,
            grid=(grid_n,),
            in_specs=[
                pl.BlockSpec((tile_n, 1), lambda i: (i, 0)),
                pl.BlockSpec((2, C), lambda i: (0, 0)),
            ],
            out_specs=pl.BlockSpec((tile_n, C), lambda i: (i, 0)),
        ),
        compiler_params=pltpu.CompilerParams(
            dimension_semantics=("parallel",),  # shards row tiles across TCs on v7x
        ),
        cost_estimate=cost,
    )(x2, fp_table)


def mp_fourier_ref(x, freqs, phases):
    """Pure-JAX reference mirroring the PyTorch forward."""
    y = x.astype(jnp.float32)[:, None] * freqs[None, :].astype(jnp.float32)
    y = y + phases[None, :].astype(jnp.float32)
    y = jnp.cos(y) * np.sqrt(2.0)
    return x[:, None] * y.astype(x.dtype)


if __name__ == "__main__":
    num_channels = 32   # MPFourier(num_channels=32)
    bandwidth = 1.0

    key = jax.random.PRNGKey(0)
    k_f, k_p, k_x1, k_x2, k_x3 = jax.random.split(key, 5)

    # Deterministic "buffers" matching the PyTorch __init__:
    #   freqs  = 2*pi * randn(C) * bandwidth
    #   phases = 2*pi * rand(C)
    freqs = (2.0 * np.pi) * jax.random.normal(k_f, (num_channels,), dtype=jnp.float32) * bandwidth
    phases = (2.0 * np.pi) * jax.random.uniform(k_p, (num_channels,), dtype=jnp.float32)

    # Hoisted one-time preprocessing (done once, reused across calls).
    fp_table = jax.block_until_ready(prepare_mp_fourier_table(freqs, phases))

    test_cases = (
        (k_x1, 8),     # realistic tiny batch of timesteps: single (8, 32) block
        (k_x2, 300),   # non-multiple-of-8 N: single full-extent (300, 32) block
        (k_x3, 4096),  # large N: grid = 2 x 2048-row tiles, parallel across TCs
    )
    for k_x, n in test_cases:
        x = jax.random.normal(k_x, (n,), dtype=jnp.float32)
        out = jax.block_until_ready(mp_fourier(x, fp_table))
        ref = mp_fourier_ref(x, freqs, phases)
        np.testing.assert_allclose(np.asarray(out), np.asarray(ref), rtol=1e-5, atol=1e-4)

    print("KERNEL_OK")
</pallas_src>

<mosaic_0001>
module attributes {stable_mosaic.version = 11 : i64} {
  func.func @_mpfourier_kernel(%arg0: i32, %arg1: memref<8x1xf32, #tpu.memory_space<vmem>>, %arg2: memref<2x32xf32, #tpu.memory_space<vmem>>, %arg3: memref<8x32xf32, #tpu.memory_space<vmem>>) attributes {dimension_semantics = [#tpu.dimension_semantics<parallel>], iteration_bounds = array<i64: 1>, scalar_prefetch = 0 : i64, scratch_operands = 0 : i64, tpu.core_type = #tpu.core_type<tc>, window_params = [{transform_indices = @transform_0, window_bounds = array<i64: 8, 1>}, {pipeline_mode = #tpu.pipeline_mode<synchronous>, transform_indices = @transform_1, window_bounds = array<i64: 2, 32>}, {transform_indices = @transform_2, window_bounds = array<i64: 8, 32>}]} {
    %c0 = arith.constant 0 : index
    %c0_0 = arith.constant 0 : index
    %0 = vector.load %arg2[%c0, %c0_0] : memref<2x32xf32, #tpu.memory_space<vmem>>, vector<2x32xf32>
    %1 = vector.extract_strided_slice %0 {offsets = [0, 0], sizes = [1, 32], strides = [1, 1]} : vector<2x32xf32> to vector<1x32xf32>
    %2 = vector.extract_strided_slice %0 {offsets = [1, 0], sizes = [1, 32], strides = [1, 1]} : vector<2x32xf32> to vector<1x32xf32>
    %c0_1 = arith.constant 0 : index
    %c0_2 = arith.constant 0 : index
    %3 = vector.load %arg1[%c0_1, %c0_2] : memref<8x1xf32, #tpu.memory_space<vmem>>, vector<8x1xf32>
    %4 = vector.broadcast %3 : vector<8x1xf32> to vector<8x32xf32>
    %5 = vector.broadcast %1 : vector<1x32xf32> to vector<8x32xf32>
    %6 = arith.mulf %4, %5 : vector<8x32xf32>
    %7 = vector.broadcast %2 : vector<1x32xf32> to vector<8x32xf32>
    %8 = arith.addf %6, %7 : vector<8x32xf32>
    %9 = math.cos %8 : vector<8x32xf32>
    %cst = arith.constant 1.41421354 : f32
    %10 = vector.broadcast %cst : f32 to vector<8x32xf32>
    %11 = arith.mulf %9, %10 : vector<8x32xf32>
    %c0_3 = arith.constant 0 : index
    %c0_4 = arith.constant 0 : index
    %12 = vector.load %arg1[%c0_3, %c0_4] : memref<8x1xf32, #tpu.memory_space<vmem>>, vector<8x1xf32>
    %13 = vector.broadcast %12 : vector<8x1xf32> to vector<8x32xf32>
    %14 = arith.mulf %13, %11 : vector<8x32xf32>
    %c0_5 = arith.constant 0 : index
    %c0_6 = arith.constant 0 : index
    %15 = vector.load %arg3[%c0_5, %c0_6] : memref<8x32xf32, #tpu.memory_space<vmem>>, vector<8x32xf32>
    tpu.vector_store %arg3[%c0_5, %c0_6], %14 {strides = array<i32>} : memref<8x32xf32, #tpu.memory_space<vmem>>, vector<8x32xf32>,
    return
  }
  func.func @transform_0(%arg0: i32) -> (i32, i32) {
    %c0_i32 = arith.constant 0 : i32
    %c0_i32_0 = arith.constant 0 : i32
    return %arg0, %c0_i32 : i32, i32
  }
  func.func @transform_1(%arg0: i32) -> (i32, i32) {
    %c0_i32 = arith.constant 0 : i32
    %c0_i32_0 = arith.constant 0 : i32
    %c0_i32_1 = arith.constant 0 : i32
    return %c0_i32, %c0_i32_0 : i32, i32
  }
  func.func @transform_2(%arg0: i32) -> (i32, i32) {
    %c0_i32 = arith.constant 0 : i32
    %c0_i32_0 = arith.constant 0 : i32
    return %arg0, %c0_i32 : i32, i32
  }
}

</mosaic_0001>

<bundles_post_ra>
// kernel: tpu_custom_call.1
= control target key start
LH: loop header
LB: loop body
LE: loop exit
PB: predicated region body
PF: predicated region fallthrough
CT: control target
= control target key end

     0   :  { %v195_v1 = vmov 0   ;;  %s261_s0 = inlined_call_operand.vmem [shape: f32[8,1], index: 0, kind: input, shape index: {}]   ;;  %s262_s1 = inlined_call_operand.vmem [shape: f32[2,32], index: 1, kind: input, shape index: {}]   ;;  %s263_s2 = inlined_call_operand.hbm [shape: f32[8,32], index: 2, kind: output, shape index: {}]  }
   0x1   :  { %v13_v0 = vld [vmem:[%s261_s0] sm:$0xff]  ;;  %166 = vset.pattern.permute.xlu0 %v195_v1 }
   0x2   :  { %16 = vperm.xlu0 %166, %v13_v0  }
   0x3   :  { %7 = vsyncpa [#allocation3], 0  ;;  %v19_v2 = vlaneseq  ;;  %v12_v5 = vld [vmem:[%s262_s1] sm:$0x3]  ;;  %v196_v22 = vmov 683565275  }
   0x4   :  { %v197_v24 = vmov 2475754826   ;;  %v198_v27 = vmov 2131351028   ;;  %v199_v30 = vmov 2102212464  }
   0x5   :  { %v20_v3 = vshrl.u32 %v19_v2, 7  ;;  %v200_v33 = vmov 920167782   ;;  %v201_v36 = vmov 1326507024   ;;  %s202_s0 = smov [#allocation2]  }
   0x6   :  { %s142_s1 = sshll.u32 %s202_s0, 4  ;;  %vm134_vm13 = vcmask 261120   ;;  %s143_s1 = int_to_ptr.vmem [resolvable:$true] %s142_s1 }
   0x7   :  { %v21_v4 = vsub.s32 0, %v20_v3  ;;  %v26_v6 = vsub.s32 1, %v20_v3  ;;  %s171_s13 = scalar_lea.vmem %s143_s1, 128  ;;  %p176_p1 = scmp.lt.s32.totalorder %s143_s1, %s143_s1 }
   0x8   :  { %p172_p0 = scmp.ne.s32.totalorder %s143_s1, %s171_s13  ;;  %p177_p2 = scmp.lt.s32.totalorder %s171_s13, %s171_s13 }
   0x9   :  { %v22_v7 = vrot.slane %v12_v5, %v21_v4  ;;  %v27_v8 = vrot.slane %v12_v5, %v26_v6 }
   0xa   :  { %p178_p3 = por %p177_p2, %p176_p1 }
   0xc   :  { %p179_p4 = pnand %p178_p3, %p172_p0 }
  0x81   :  { %v224_v9 = vpop.permute.xlu0 %16 }
  0x82   :  { %v23_v10 = vmul.f32 %v22_v7, %v224_v9 }
  0x84   :  { %v227_v11 = vadd.f32 %v27_v8, %v23_v10 }
  0x86   :  { %v32_v12 = vand.u32 2139095040, %v227_v11  ;;  %v29_v16 = vand.u32 2147483647, %v227_v11  ;;  %vm31_vm7 = vcmp.lt.s32.totalorder %v227_v11, 0  ;;  %vm121_vm12 = vweird.f32 %v227_v11 }
  0x88   :  { %v33_v13 = vshrl.u32 %v32_v12, 23  ;;  %v36_v19 = vand.u32 8388607, %v29_v16  ;;  %vm30_vm8 = vcmp.le.f32.partialorder %v29_v16, 0.7853982 }
  0x8a   :  { %v150_v14 = vadd.s32 4294967169, %v33_v13  ;;  %v37_v38 = vor.u32 8388608, %v36_v19 }
  0x8c   :  { %v39_v15 = vadd.s32 1, %v150_v14  ;;  %v77_v52 = vshll.u32 %v37_v38, 8 }
  0x8e   :  { %vm40_vm0 = vcmp.gt.s32.totalorder %v39_v15, 0 }
  0x8f   :  { %v41_v17 = vsel %vm40_vm0, %v39_v15, 0 }
  0x90   :  { %v43_v18 = vand.u32 31, %v41_v17  ;;  %v42_v21 = vshrl.u32 %v41_v17, 5 }
  0x92   :  { %v44_v20 = vsub.s32 32, %v43_v18  ;;  %v46_v23 = vshll.u32 %v196_v22, %v43_v18  ;;  %v49_v25 = vshll.u32 %v197_v24, %v43_v18  ;;  %v52_v29 = vshll.u32 %v198_v27, %v43_v18 }
  0x93   :  { %v55_v32 = vshll.u32 %v199_v30, %v43_v18  ;;  %v58_v35 = vshll.u32 %v200_v33, %v43_v18  ;;  %vm61_vm1 = vcmp.lt.s32.totalorder %v42_v21, 1  ;;  %vm64_vm2 = vcmp.lt.s32.totalorder %v42_v21, 4 }
  0x94   :  { %v47_v26 = vshrl.u32 %v197_v24, %v44_v20  ;;  %v50_v28 = vshrl.u32 %v198_v27, %v44_v20  ;;  %v53_v31 = vshrl.u32 %v199_v30, %v44_v20  ;;  %v56_v34 = vshrl.u32 %v200_v33, %v44_v20 }
  0x95   :  { %v59_v37 = vshrl.u32 %v201_v36, %v44_v20  ;;  %v45_v47 = vshrl.u32 %v196_v22, %v44_v20  ;;  %vm63_vm3 = vcmp.lt.s32.totalorder %v42_v21, 3  ;;  %vm62_vm4 = vcmp.lt.s32.totalorder %v42_v21, 2 }
  0x96   :  { %v48_v39 = vor.u32 %v47_v26, %v46_v23  ;;  %v51_v40 = vor.u32 %v50_v28, %v49_v25  ;;  %v54_v41 = vor.u32 %v53_v31, %v52_v29  ;;  %v57_v42 = vor.u32 %v56_v34, %v55_v32 }
  0x97   :  { %v60_v43 = vor.u32 %v59_v37, %v58_v35 }
  0x98   :  { %v66_v44 = vsel %vm64_vm2, %v54_v41, 2102212464  ;;  %v69_v45 = vsel %vm61_vm1, %v48_v39, %v51_v40  ;;  %v73_v46 = vsel %vm61_vm1, %v51_v40, %v54_v41  ;;  %v70_v48 = vsel %vm64_vm2, %v57_v42, 920167782 }
  0x99   :  { %v74_v49 = vsel %vm64_vm2, %v60_v43, 1326507024  ;;  %v71_v50 = vsel %vm63_vm3, %v54_v41, %v70_v48  ;;  %v65_v53 = vsel %vm61_vm1, %v45_v47, %v48_v39  ;;  %v67_v54 = vsel %vm63_vm3, %v51_v40, %v66_v44 }
  0x9a   :  { %v75_v51 = vsel %vm63_vm3, %v57_v42, %v74_v49  ;;  %v72_v55 = vsel %vm62_vm4, %v69_v45, %v71_v50  ;;  %v68_v61 = vsel %vm62_vm4, %v65_v53, %v67_v54 }
  0x9b   :  { %v76_v56 = vsel %vm62_vm4, %v73_v46, %v75_v51  ;;  %v236_v59 = vmul.u32.u64.low %v77_v52, %v72_v55  ;;  %v237_v60 = vmul.u32.u64.high %v77_v52, %v72_v55, %v236_v59  ;;  %v84_v63 = vmul.u32 %v77_v52, %v68_v61 }
  0x9c   :  { %v233_v57 = vmul.u32.u64.low %v77_v52, %v76_v56  ;;  %v234_v58 = vmul.u32.u64.high %v77_v52, %v76_v56, %v233_v57 }
  0x9d   :  { %v87_v62 = vadd.s32 1, %v237_v60 }
  0x9e   :  { %vm86_vm5 = vc.u32 %v234_v58, %v236_v59  ;;  %v85_v13 = vadd.s32 %v236_v59, %v234_v58 }
  0x9f   :  { %v88_v0 = vsel %vm86_vm5, %v87_v62, %v237_v60 }
  0xa0   :  { %v89_v1 = vadd.s32 %v88_v0, %v84_v63 }
  0xa2   :  { %v90_v2 = vadd.s32 536870912, %v89_v1 }
  0xa4   :  { %v91_v3 = vshrl.u32 %v90_v2, 30 }
  0xa6   :  { %v92_v4 = vshll.u32 %v91_v3, 30  ;;  %v115_v28 = vsub.s32 4, %v91_v3 }
  0xa8   :  { %v93_v5 = vsub.s32 %v89_v1, %v92_v4  ;;  %v116_v30 = vsel %vm31_vm7, %v115_v28, %v91_v3 }
  0xa9   :  { %v118_v31 = vsel %vm30_vm8, 0, %v116_v30 }
  0xaa   :  { %v95_v6 = vsub.s32 0, %v93_v5  ;;  %v122_v32 = vand.u32 3, %v118_v31 }
  0xac   :  { %v151_v7 = vmin.u32 %v95_v6, %v93_v5  ;;  %vm127_vm9 = vcmp.eq.s32.totalorder %v122_v32, 2  ;;  %vm124_vm10 = vcmp.eq.s32.totalorder %v122_v32, 0  ;;  %vm123_vm11 = vcmp.lt.s32.totalorder %v122_v32, 2 }
  0xae   :  { %v97_v8 = vclz %v151_v7 }
  0xb0   :  { %v152_v10 = vadd.s32 4294967294, %v97_v8 }
  0xb2   :  { %vm153_vm6 = vcmp.lt.s32.totalorder %v152_v10, 0 }
  0xb3   :  { %v100_v12 = vsel %vm153_vm6, 0, %v152_v10 }
  0xb4   :  { %v101_v14 = vsub.s32 32, %v100_v12  ;;  %v105_v15 = vsub.s32 4294967266, %v100_v12  ;;  %v102_v17 = vshll.u32 %v93_v5, %v100_v12 }
  0xb6   :  { %v103_v18 = vshrl.u32 %v85_v13, %v101_v14  ;;  %v106_v19 = vadd.s32 127, %v105_v15 }
  0xb8   :  { %v104_v20 = vor.u32 %v103_v18, %v102_v17  ;;  %v107_v21 = vshll.u32 %v106_v19, 23 }
  0xba   :  { %v108_v22 = vor.u32 4788187, %v107_v21  ;;  %v111_v24 = vcvt.s32.f32 %v104_v20 }
  0xbc   :  { %v109_v23 = vand.u32 2147483647, %v108_v22 }
  0xbe   :  { %v112_v25 = vmul.f32 %v111_v24, %v109_v23 }
  0xc0   :  { %v113_v26 = vxor.u32 2147483648, %v112_v25 }
  0xc2   :  { %v114_v27 = vsel %vm31_vm7, %v113_v26, %v112_v25 }
  0xc3   :  { %v117_v29 = vsel %vm30_vm8, %v227_v11, %v114_v27 }
  0xc4   :  { %167 = vcosq.f32 %v117_v29 }
  0xc5   :  { %169 = vsinq.f32 %v117_v29 }
  0xce   :  { %v168_v33 = vpop.eup %167 }
  0xcf   :  { %v170_v34 = vpop.eup %169  ;;  %v128_v35 = vxor.u32 2147483648, %v168_v33 }
  0xd0   :  { %v125_v36 = vxor.u32 2147483648, %v170_v34 }
  0xd1   :  { %v129_v37 = vsel %vm127_vm9, %v128_v35, %v170_v34 }
  0xd2   :  { %v126_v38 = vsel %vm124_vm10, %v168_v33, %v125_v36 }
  0xd3   :  { %v130_v16 = vsel %vm123_vm11, %v126_v38, %v129_v37 }
  0xd4   :  { %v131_v39 = vsel %vm121_vm12, nan, %v130_v16 }
  0xd5   :  { %v132_v40 = vmul.f32 1.4142135, %v131_v39 }
  0xd7   :  { %v133_v41 = vmul.f32 %v132_v40, %v224_v9 }
  0xd9   :  { %135 = vst.msk [vmem:[#allocation2] sm:$0xff] %vm134_vm13, %v133_v41 }
  0xda   :  { %182 = shalt.err (!%p179_p4)
}
  0xdb   :  { %s183_s16 = scalar_lea.hbm %s263_s2, 128 }
  0xdc   :  { %p184_p5 = scmp.ne.s32.totalorder %s263_s2, %s183_s16  ;;  %p187_p6 = scmp.lt.u32.totalorder %s183_s16, %s263_s2 }
  0xde   :  { %p189_p7 = pnand %p187_p6, %p184_p5 }
  0xe0   :  { %192 = shalt.err (!%p189_p7)
}
  0xe1   :  { %145 = dma.vmem_to_hbm [thread:$0]  %s143_s1, 128, %s263_s2, [#allocation3]  }
  0xe2   :  { %193 = dma.done.wait [#allocation3], 128  }
  0xe3   :  { %194 = vsyncadd [#allocation3], 4294967168 }
  0xe4   :  { %149 = vsyncpa [#allocation3], 1 }

</bundles_post_ra>
